<compile_context>
chip_gen: v7x
topology: tpu7x:2x2x1
jax: 0.10.0
libtpu: 0.0.40
codegen_flags: <defaults>
</compile_context>

<pallas_src>
import jax
import jax.numpy as jnp
from jax.experimental import pallas as pl
from jax.experimental.pallas import tpu as pltpu

SMOOTH = 1e-5
DO_BG = False          # background channel (c=0) excluded from dice
WEIGHT_CE = 1.0
WEIGHT_DICE = 1.0
LANE = 128
# TODO(synk): ignore_label handling (masked dice / CE skip) not implemented; ignore_label=None here.


def _round_up(x, m):
    return (x + m - 1) // m * m


def _dc_ce_kernel(logits_ref, target_ref, ce_out_ref, stats_out_ref,
                  ce_acc, inter_acc, pred_acc, gt_acc):
    s_idx = pl.program_id(1)
    n_s = pl.num_programs(1)

    @pl.when(s_idx == 0)
    def _():
        ce_acc[...] = jnp.zeros_like(ce_acc)
        inter_acc[...] = jnp.zeros_like(inter_acc)
        pred_acc[...] = jnp.zeros_like(pred_acc)
        gt_acc[...] = jnp.zeros_like(gt_acc)

    logits = logits_ref[0].astype(jnp.float32)     # (C, S_TILE, 128)
    tgt = target_ref[0, 0]                         # (S_TILE, 128) int32
    C = logits.shape[0]

    # Numerically-stable softmax / log-softmax over the channel axis.  Channel
    # is the leading axis, so these reductions are elementwise across C tiles.
    m = jnp.max(logits, axis=0)                    # (S_TILE, 128)
    e = jnp.exp(logits - m[None])                  # (C, S_TILE, 128)
    ssum = jnp.sum(e, axis=0)                      # (S_TILE, 128)
    logsumexp = m + jnp.log(ssum)                  # (S_TILE, 128)

    # Padded pixels carry target == -1 -> valid == 0 masks them out everywhere.
    valid = (tgt >= 0).astype(jnp.float32)         # (S_TILE, 128)
    inv_s = pl.reciprocal(ssum, approx=False) * valid   # EUP recip, fold pad mask
    probs = e * inv_s[None]                        # (C, S_TILE, 128), 0 on pads

    # One-hot mask of the target class, computed once and reused.
    ch = jax.lax.broadcasted_iota(jnp.int32, logits.shape, 0)
    mask = ch == tgt[None]                         # (C, S_TILE, 128) bool
    maskf = mask.astype(jnp.float32)

    # ---- RobustCrossEntropyLoss partial: sum over pixels of (lse - z[target]) ----
    picked = jnp.sum(jnp.where(mask, logits, 0.0), axis=0)    # (S_TILE, 128)
    ce_acc[...] += valid * (logsumexp - picked)

    # ---- MemoryEfficientSoftDiceLoss partial sums (full-width, VALU adds only) ----
    inter_acc[...] += probs * maskf
    pred_acc[...] += probs
    gt_acc[...] += maskf

    # Per-batch finalize: one cross-sublane reduce, lane-wide (dense) outputs.
    @pl.when(s_idx == n_s - 1)
    def _():
        ce_out_ref[0] = jnp.sum(ce_acc[...], axis=0, keepdims=True)   # (1, 128)
        stats_out_ref[0, 0] = jnp.sum(inter_acc[...], axis=1)         # (C, 128)
        stats_out_ref[0, 1] = jnp.sum(pred_acc[...], axis=1)
        stats_out_ref[0, 2] = jnp.sum(gt_acc[...], axis=1)


def dc_and_ce_loss(net_output, target, *, s_tile=128):
    """net_output: (B, C, H, W) float logits; target: (B, 1, H, W) int class ids."""
    B, C, H, W = net_output.shape
    HW = H * W

    S = pl.cdiv(HW, LANE)                                  # sublane rows of pixels
    s_tile = max(8, min(_round_up(s_tile, 8), _round_up(S, 8)))
    S_pad = _round_up(S, s_tile)
    HW_pad = S_pad * LANE
    n_s = S_pad // s_tile

    logits = net_output.reshape(B, C, HW)
    if not jnp.issubdtype(logits.dtype, jnp.floating):
        logits = logits.astype(jnp.float32)                # bf16/f32 pass through, cast in-kernel
    tgt = target.reshape(B, 1, HW).astype(jnp.int32)

    pad = HW_pad - HW
    if pad:
        logits = jnp.pad(logits, ((0, 0), (0, 0), (0, pad)))
        tgt = jnp.pad(tgt, ((0, 0), (0, 0), (0, pad)), constant_values=-1)
    logits = logits.reshape(B, C, S_pad, LANE)
    tgt = tgt.reshape(B, 1, S_pad, LANE)

    ce_part, stats = pl.pallas_call(
        _dc_ce_kernel,
        out_shape=(jax.ShapeDtypeStruct((B, 1, LANE), jnp.float32),
                   jax.ShapeDtypeStruct((B, 3, C, LANE), jnp.float32)),
        grid_spec=pltpu.PrefetchScalarGridSpec(
            num_scalar_prefetch=0,
            grid=(B, n_s),
            in_specs=[
                pl.BlockSpec((1, C, s_tile, LANE), lambda b, s: (b, 0, s, 0)),
                pl.BlockSpec((1, 1, s_tile, LANE), lambda b, s: (b, 0, s, 0)),
            ],
            out_specs=[
                pl.BlockSpec((1, 1, LANE), lambda b, s: (b, 0, 0)),
                pl.BlockSpec((1, 3, C, LANE), lambda b, s: (b, 0, 0, 0)),
            ],
            scratch_shapes=[
                pltpu.VMEM((s_tile, LANE), jnp.float32),        # CE partial
                pltpu.VMEM((C, s_tile, LANE), jnp.float32),     # intersect
                pltpu.VMEM((C, s_tile, LANE), jnp.float32),     # sum_pred
                pltpu.VMEM((C, s_tile, LANE), jnp.float32),     # sum_gt
            ],
        ),
        compiler_params=pltpu.CompilerParams(
            dimension_semantics=("parallel", "arbitrary"),      # B shardable across TCs
            vmem_limit_bytes=32 * 1024 * 1024,
        ),
    )(logits, tgt)

    # Tiny wrapper-side finalize (per-b scalars only).
    ce_loss = jnp.sum(ce_part) / jnp.float32(B * HW)            # mean CE over all pixels

    intersect = jnp.sum(stats[:, 0], axis=-1)                   # (B, C)
    sum_pred = jnp.sum(stats[:, 1], axis=-1)
    sum_gt = jnp.sum(stats[:, 2], axis=-1)
    dc = (2.0 * intersect + SMOOTH) / jnp.maximum(sum_pred + sum_gt + SMOOTH, 1e-8)
    if not DO_BG:
        dc = dc[:, 1:]                                          # drop background class
    dice_loss = -jnp.mean(dc)
    return WEIGHT_CE * ce_loss + WEIGHT_DICE * dice_loss


def _reference(net_output, target):
    """Pure-JAX reference of DC_and_CE_loss forward (same kwargs)."""
    B, C, H, W = net_output.shape
    t = target[:, 0]
    logp = jax.nn.log_softmax(net_output, axis=1)
    ce = -jnp.mean(jnp.take_along_axis(logp, t[:, None], axis=1)[:, 0])
    probs = jax.nn.softmax(net_output, axis=1)
    onehot = jax.nn.one_hot(t, C, axis=1, dtype=jnp.float32)
    axes = (2, 3)
    intersect = jnp.sum(probs * onehot, axis=axes)
    sum_pred = jnp.sum(probs, axis=axes)
    sum_gt = jnp.sum(onehot, axis=axes)
    dc = (2.0 * intersect + SMOOTH) / jnp.maximum(sum_pred + sum_gt + SMOOTH, 1e-8)
    dc = dc[:, 1:] if not DO_BG else dc
    return WEIGHT_CE * ce + WEIGHT_DICE * (-jnp.mean(dc))


if __name__ == "__main__":
    key = jax.random.PRNGKey(0)
    k1, k2 = jax.random.split(key)
    B, C, H, W = 2, 4, 16, 16
    net_output = jax.random.normal(k1, (B, C, H, W), dtype=jnp.float32)
    target = jax.random.randint(k2, (B, 1, H, W), 0, C, dtype=jnp.int32)

    loss = jax.jit(dc_and_ce_loss)(net_output, target)
    jax.block_until_ready(loss)

    ref = _reference(net_output, target)
    assert jnp.allclose(loss, ref, rtol=1e-5, atol=1e-5), (loss, ref)
    print("KERNEL_OK")
</pallas_src>

<mosaic_0001>
module attributes {stable_mosaic.version = 11 : i64} {
  func.func @_dc_ce_kernel(%arg0: i32, %arg1: i32, %arg2: memref<1x4x8x128xf32, #tpu.memory_space<vmem>>, %arg3: memref<1x1x8x128xi32, #tpu.memory_space<vmem>>, %arg4: memref<1x1x128xf32, #tpu.memory_space<vmem>>, %arg5: memref<1x3x4x128xf32, #tpu.memory_space<vmem>>, %arg6: memref<8x128xf32, #tpu.memory_space<vmem>>, %arg7: memref<4x8x128xf32, #tpu.memory_space<vmem>>, %arg8: memref<4x8x128xf32, #tpu.memory_space<vmem>>, %arg9: memref<4x8x128xf32, #tpu.memory_space<vmem>>) attributes {dimension_semantics = [#tpu.dimension_semantics<parallel>, #tpu.dimension_semantics<arbitrary>], iteration_bounds = array<i64: 2, 1>, scalar_prefetch = 0 : i64, scratch_operands = 4 : i64, tpu.core_type = #tpu.core_type<tc>, window_params = [{transform_indices = @transform_0, window_bounds = array<i64: 1, 4, 8, 128>}, {transform_indices = @transform_1, window_bounds = array<i64: 1, 1, 8, 128>}, {transform_indices = @transform_2, window_bounds = array<i64: 1, 1, 128>}, {transform_indices = @transform_3, window_bounds = array<i64: 1, 3, 4, 128>}]} {
    %c0_i32 = arith.constant 0 : i32
    %0 = arith.cmpi eq, %arg1, %c0_i32 : i32
    %1 = arith.extui %0 : i1 to i32
    %c0_i32_0 = arith.constant 0 : i32
    %2 = arith.cmpi ne, %1, %c0_i32_0 : i32
    scf.if %2 {
      %cst_36 = arith.constant 0.000000e+00 : f32
      %51 = vector.broadcast %cst_36 : f32 to vector<8x128xf32>
      %c0_37 = arith.constant 0 : index
      %c0_38 = arith.constant 0 : index
      %52 = vector.load %arg6[%c0_37, %c0_38] : memref<8x128xf32, #tpu.memory_space<vmem>>, vector<8x128xf32>
      tpu.vector_store %arg6[%c0_37, %c0_38], %51 {strides = array<i32>} : memref<8x128xf32, #tpu.memory_space<vmem>>, vector<8x128xf32>,
      %cst_39 = arith.constant 0.000000e+00 : f32
      %53 = vector.broadcast %cst_39 : f32 to vector<4x8x128xf32>
      %c0_40 = arith.constant 0 : index
      %c0_41 = arith.constant 0 : index
      %c0_42 = arith.constant 0 : index
      %54 = vector.load %arg7[%c0_40, %c0_41, %c0_42] : memref<4x8x128xf32, #tpu.memory_space<vmem>>, vector<4x8x128xf32>
      tpu.vector_store %arg7[%c0_40, %c0_41, %c0_42], %53 {strides = array<i32>} : memref<4x8x128xf32, #tpu.memory_space<vmem>>, vector<4x8x128xf32>,
      %cst_43 = arith.constant 0.000000e+00 : f32
      %55 = vector.broadcast %cst_43 : f32 to vector<4x8x128xf32>
      %c0_44 = arith.constant 0 : index
      %c0_45 = arith.constant 0 : index
      %c0_46 = arith.constant 0 : index
      %56 = vector.load %arg8[%c0_44, %c0_45, %c0_46] : memref<4x8x128xf32, #tpu.memory_space<vmem>>, vector<4x8x128xf32>
      tpu.vector_store %arg8[%c0_44, %c0_45, %c0_46], %55 {strides = array<i32>} : memref<4x8x128xf32, #tpu.memory_space<vmem>>, vector<4x8x128xf32>,
      %cst_47 = arith.constant 0.000000e+00 : f32
      %57 = vector.broadcast %cst_47 : f32 to vector<4x8x128xf32>
      %c0_48 = arith.constant 0 : index
      %c0_49 = arith.constant 0 : index
      %c0_50 = arith.constant 0 : index
      %58 = vector.load %arg9[%c0_48, %c0_49, %c0_50] : memref<4x8x128xf32, #tpu.memory_space<vmem>>, vector<4x8x128xf32>
      tpu.vector_store %arg9[%c0_48, %c0_49, %c0_50], %57 {strides = array<i32>} : memref<4x8x128xf32, #tpu.memory_space<vmem>>, vector<4x8x128xf32>,
    } else {
    }
    %c0 = arith.constant 0 : index
    %c0_1 = arith.constant 0 : index
    %c0_2 = arith.constant 0 : index
    %c0_3 = arith.constant 0 : index
    %3 = vector.load %arg2[%c0, %c0_1, %c0_2, %c0_3] : memref<1x4x8x128xf32, #tpu.memory_space<vmem>>, vector<1x4x8x128xf32>
    %4 = vector.shape_cast %3 : vector<1x4x8x128xf32> to vector<4x8x128xf32>
    %c0_4 = arith.constant 0 : index
    %c0_5 = arith.constant 0 : index
    %c0_6 = arith.constant 0 : index
    %c0_7 = arith.constant 0 : index
    %5 = vector.load %arg3[%c0_4, %c0_5, %c0_6, %c0_7] : memref<1x1x8x128xi32, #tpu.memory_space<vmem>>, vector<1x1x8x128xi32>
    %6 = vector.shape_cast %5 : vector<1x1x8x128xi32> to vector<8x128xi32>
    %cst = arith.constant dense<0xFF800000> : vector<8x128xf32>
    %7 = vector.multi_reduction <maximumf>, %4, %cst [0] : vector<4x8x128xf32> to vector<8x128xf32>
    %8 = vector.shape_cast %7 : vector<8x128xf32> to vector<1x8x128xf32>
    %9 = vector.broadcast %8 : vector<1x8x128xf32> to vector<4x8x128xf32>
    %10 = arith.subf %4, %9 : vector<4x8x128xf32>
    %11 = math.exp %10 : vector<4x8x128xf32>
    %cst_8 = arith.constant dense<0.000000e+00> : vector<8x128xf32>
    %12 = vector.multi_reduction <add>, %11, %cst_8 [0] : vector<4x8x128xf32> to vector<8x128xf32>
    %13 = math.log %12 : vector<8x128xf32>
    %14 = arith.addf %7, %13 : vector<8x128xf32>
    %c0_i32_9 = arith.constant 0 : i32
    %15 = vector.broadcast %c0_i32_9 : i32 to vector<8x128xi32>
    %16 = arith.cmpi sge, %6, %15 : vector<8x128xi32>
    %17 = arith.extui %16 : vector<8x128xi1> to vector<8x128xi32>
    %18 = arith.sitofp %17 : vector<8x128xi32> to vector<8x128xf32>
    %19 = tpu.reciprocal %12 : vector<8x128xf32> -> vector<8x128xf32>
    %20 = arith.mulf %19, %18 : vector<8x128xf32>
    %21 = vector.shape_cast %20 : vector<8x128xf32> to vector<1x8x128xf32>
    %22 = vector.broadcast %21 : vector<1x8x128xf32> to vector<4x8x128xf32>
    %23 = arith.mulf %11, %22 : vector<4x8x128xf32>
    %24 = tpu.iota {dimensions = array<i32: 0>} : vector<4x8x128xi32>
    %25 = vector.shape_cast %6 : vector<8x128xi32> to vector<1x8x128xi32>
    %26 = vector.broadcast %25 : vector<1x8x128xi32> to vector<4x8x128xi32>
    %27 = arith.cmpi eq, %24, %26 : vector<4x8x128xi32>
    %28 = arith.extui %27 : vector<4x8x128xi1> to vector<4x8x128xi32>
    %29 = arith.sitofp %28 : vector<4x8x128xi32> to vector<4x8x128xf32>
    %cst_10 = arith.constant 0.000000e+00 : f32
    %30 = vector.broadcast %cst_10 : f32 to vector<4x8x128xf32>
    %31 = arith.select %27, %4, %30 : vector<4x8x128xi1>, vector<4x8x128xf32>
    %cst_11 = arith.constant dense<0.000000e+00> : vector<8x128xf32>
    %32 = vector.multi_reduction <add>, %31, %cst_11 [0] : vector<4x8x128xf32> to vector<8x128xf32>
    %c0_12 = arith.constant 0 : index
    %c0_13 = arith.constant 0 : index
    %33 = vector.load %arg6[%c0_12, %c0_13] : memref<8x128xf32, #tpu.memory_space<vmem>>, vector<8x128xf32>
    %34 = arith.subf %14, %32 : vector<8x128xf32>
    %35 = arith.mulf %18, %34 : vector<8x128xf32>
    %36 = arith.addf %33, %35 : vector<8x128xf32>
    %c0_14 = arith.constant 0 : index
    %c0_15 = arith.constant 0 : index
    %37 = vector.load %arg6[%c0_14, %c0_15] : memref<8x128xf32, #tpu.memory_space<vmem>>, vector<8x128xf32>
    tpu.vector_store %arg6[%c0_14, %c0_15], %36 {strides = array<i32>} : memref<8x128xf32, #tpu.memory_space<vmem>>, vector<8x128xf32>,
    %c0_16 = arith.constant 0 : index
    %c0_17 = arith.constant 0 : index
    %c0_18 = arith.constant 0 : index
    %38 = vector.load %arg7[%c0_16, %c0_17, %c0_18] : memref<4x8x128xf32, #tpu.memory_space<vmem>>, vector<4x8x128xf32>
    %39 = arith.mulf %23, %29 : vector<4x8x128xf32>
    %40 = arith.addf %38, %39 : vector<4x8x128xf32>
    %c0_19 = arith.constant 0 : index
    %c0_20 = arith.constant 0 : index
    %c0_21 = arith.constant 0 : index
    %41 = vector.load %arg7[%c0_19, %c0_20, %c0_21] : memref<4x8x128xf32, #tpu.memory_space<vmem>>, vector<4x8x128xf32>
    tpu.vector_store %arg7[%c0_19, %c0_20, %c0_21], %40 {strides = array<i32>} : memref<4x8x128xf32, #tpu.memory_space<vmem>>, vector<4x8x128xf32>,
    %c0_22 = arith.constant 0 : index
    %c0_23 = arith.constant 0 : index
    %c0_24 = arith.constant 0 : index
    %42 = vector.load %arg8[%c0_22, %c0_23, %c0_24] : memref<4x8x128xf32, #tpu.memory_space<vmem>>, vector<4x8x128xf32>
    %43 = arith.addf %42, %23 : vector<4x8x128xf32>
    %c0_25 = arith.constant 0 : index
    %c0_26 = arith.constant 0 : index
    %c0_27 = arith.constant 0 : index
    %44 = vector.load %arg8[%c0_25, %c0_26, %c0_27] : memref<4x8x128xf32, #tpu.memory_space<vmem>>, vector<4x8x128xf32>
    tpu.vector_store %arg8[%c0_25, %c0_26, %c0_27], %43 {strides = array<i32>} : memref<4x8x128xf32, #tpu.memory_space<vmem>>, vector<4x8x128xf32>,
    %c0_28 = arith.constant 0 : index
    %c0_29 = arith.constant 0 : index
    %c0_30 = arith.constant 0 : index
    %45 = vector.load %arg9[%c0_28, %c0_29, %c0_30] : memref<4x8x128xf32, #tpu.memory_space<vmem>>, vector<4x8x128xf32>
    %46 = arith.addf %45, %29 : vector<4x8x128xf32>
    %c0_31 = arith.constant 0 : index
    %c0_32 = arith.constant 0 : index
    %c0_33 = arith.constant 0 : index
    %47 = vector.load %arg9[%c0_31, %c0_32, %c0_33] : memref<4x8x128xf32, #tpu.memory_space<vmem>>, vector<4x8x128xf32>
    tpu.vector_store %arg9[%c0_31, %c0_32, %c0_33], %46 {strides = array<i32>} : memref<4x8x128xf32, #tpu.memory_space<vmem>>, vector<4x8x128xf32>,
    %c0_i32_34 = arith.constant 0 : i32
    %48 = arith.cmpi eq, %arg1, %c0_i32_34 : i32
    %49 = arith.extui %48 : i1 to i32
    %c0_i32_35 = arith.constant 0 : i32
    %50 = arith.cmpi ne, %49, %c0_i32_35 : i32
    scf.if %50 {
      %c0_36 = arith.constant 0 : index
      %c0_37 = arith.constant 0 : index
      %51 = vector.load %arg6[%c0_36, %c0_37] : memref<8x128xf32, #tpu.memory_space<vmem>>, vector<8x128xf32>
      %cst_38 = arith.constant dense<0.000000e+00> : vector<128xf32>
      %52 = vector.multi_reduction <add>, %51, %cst_38 [0] : vector<8x128xf32> to vector<128xf32>
      %53 = vector.shape_cast %52 : vector<128xf32> to vector<1x128xf32>
      %c0_39 = arith.constant 0 : index
      %c0_40 = arith.constant 0 : index
      %c0_41 = arith.constant 0 : index
      %54 = vector.load %arg4[%c0_39, %c0_40, %c0_41] : memref<1x1x128xf32, #tpu.memory_space<vmem>>, vector<1x1x128xf32>
      %55 = vector.shape_cast %54 : vector<1x1x128xf32> to vector<1x128xf32>
      %56 = vector.shape_cast %53 : vector<1x128xf32> to vector<1x1x128xf32>
      tpu.vector_store %arg4[%c0_39, %c0_40, %c0_41], %56 {strides = array<i32>} : memref<1x1x128xf32, #tpu.memory_space<vmem>>, vector<1x1x128xf32>,
      %c0_42 = arith.constant 0 : index
      %c0_43 = arith.constant 0 : index
      %c0_44 = arith.constant 0 : index
      %57 = vector.load %arg7[%c0_42, %c0_43, %c0_44] : memref<4x8x128xf32, #tpu.memory_space<vmem>>, vector<4x8x128xf32>
      %cst_45 = arith.constant dense<0.000000e+00> : vector<4x128xf32>
      %58 = vector.multi_reduction <add>, %57, %cst_45 [1] : vector<4x8x128xf32> to vector<4x128xf32>
      %c0_46 = arith.constant 0 : index
      %c0_47 = arith.constant 0 : index
      %c0_48 = arith.constant 0 : index
      %c0_49 = arith.constant 0 : index
      %59 = vector.load %arg5[%c0_46, %c0_47, %c0_48, %c0_49] : memref<1x3x4x128xf32, #tpu.memory_space<vmem>>, vector<1x1x4x128xf32>
      %60 = vector.shape_cast %59 : vector<1x1x4x128xf32> to vector<4x128xf32>
      %61 = vector.shape_cast %58 : vector<4x128xf32> to vector<1x1x4x128xf32>
      tpu.vector_store %arg5[%c0_46, %c0_47, %c0_48, %c0_49], %61 {strides = array<i32>} : memref<1x3x4x128xf32, #tpu.memory_space<vmem>>, vector<1x1x4x128xf32>,
      %c0_50 = arith.constant 0 : index
      %c0_51 = arith.constant 0 : index
      %c0_52 = arith.constant 0 : index
      %62 = vector.load %arg8[%c0_50, %c0_51, %c0_52] : memref<4x8x128xf32, #tpu.memory_space<vmem>>, vector<4x8x128xf32>
      %cst_53 = arith.constant dense<0.000000e+00> : vector<4x128xf32>
      %63 = vector.multi_reduction <add>, %62, %cst_53 [1] : vector<4x8x128xf32> to vector<4x128xf32>
      %c0_54 = arith.constant 0 : index
      %c1 = arith.constant 1 : index
      %c0_55 = arith.constant 0 : index
      %c0_56 = arith.constant 0 : index
      %64 = vector.load %arg5[%c0_54, %c1, %c0_55, %c0_56] : memref<1x3x4x128xf32, #tpu.memory_space<vmem>>, vector<1x1x4x128xf32>
      %65 = vector.shape_cast %64 : vector<1x1x4x128xf32> to vector<4x128xf32>
      %66 = vector.shape_cast %63 : vector<4x128xf32> to vector<1x1x4x128xf32>
      tpu.vector_store %arg5[%c0_54, %c1, %c0_55, %c0_56], %66 {strides = array<i32>} : memref<1x3x4x128xf32, #tpu.memory_space<vmem>>, vector<1x1x4x128xf32>,
      %c0_57 = arith.constant 0 : index
      %c0_58 = arith.constant 0 : index
      %c0_59 = arith.constant 0 : index
      %67 = vector.load %arg9[%c0_57, %c0_58, %c0_59] : memref<4x8x128xf32, #tpu.memory_space<vmem>>, vector<4x8x128xf32>
      %cst_60 = arith.constant dense<0.000000e+00> : vector<4x128xf32>
      %68 = vector.multi_reduction <add>, %67, %cst_60 [1] : vector<4x8x128xf32> to vector<4x128xf32>
      %c0_61 = arith.constant 0 : index
      %c2 = arith.constant 2 : index
      %c0_62 = arith.constant 0 : index
      %c0_63 = arith.constant 0 : index
      %69 = vector.load %arg5[%c0_61, %c2, %c0_62, %c0_63] : memref<1x3x4x128xf32, #tpu.memory_space<vmem>>, vector<1x1x4x128xf32>
      %70 = vector.shape_cast %69 : vector<1x1x4x128xf32> to vector<4x128xf32>
      %71 = vector.shape_cast %68 : vector<4x128xf32> to vector<1x1x4x128xf32>
      tpu.vector_store %arg5[%c0_61, %c2, %c0_62, %c0_63], %71 {strides = array<i32>} : memref<1x3x4x128xf32, #tpu.memory_space<vmem>>, vector<1x1x4x128xf32>,
    } else {
    }
    return
  }
  func.func @transform_0(%arg0: i32, %arg1: i32) -> (i32, i32, i32, i32) {
    %c0_i32 = arith.constant 0 : i32
    %c0_i32_0 = arith.constant 0 : i32
    %c0_i32_1 = arith.constant 0 : i32
    return %arg0, %c0_i32, %arg1, %c0_i32_0 : i32, i32, i32, i32
  }
  func.func @transform_1(%arg0: i32, %arg1: i32) -> (i32, i32, i32, i32) {
    %c0_i32 = arith.constant 0 : i32
    %c0_i32_0 = arith.constant 0 : i32
    %c0_i32_1 = arith.constant 0 : i32
    return %arg0, %c0_i32, %arg1, %c0_i32_0 : i32, i32, i32, i32
  }
  func.func @transform_2(%arg0: i32, %arg1: i32) -> (i32, i32, i32) {
    %c0_i32 = arith.constant 0 : i32
    %c0_i32_0 = arith.constant 0 : i32
    %c0_i32_1 = arith.constant 0 : i32
    return %arg0, %c0_i32, %c0_i32_0 : i32, i32, i32
  }
  func.func @transform_3(%arg0: i32, %arg1: i32) -> (i32, i32, i32, i32) {
    %c0_i32 = arith.constant 0 : i32
    %c0_i32_0 = arith.constant 0 : i32
    %c0_i32_1 = arith.constant 0 : i32
    %c0_i32_2 = arith.constant 0 : i32
    return %arg0, %c0_i32, %c0_i32_0, %c0_i32_1 : i32, i32, i32, i32
  }
}

</mosaic_0001>

<bundles_post_ra>
// kernel: dc_and_ce_loss.1
= control target key start
LH: loop header
LB: loop body
LE: loop exit
PB: predicated region body
PF: predicated region fallthrough
CT: control target
= control target key end

     0   :  { %s685_s12 = smov 0   ;;  %s687_s13 = smov 0   ;;  %s819_s0 = inlined_call_operand.vmem [shape: f32[2,4,8,128], index: 0, kind: input, shape index: {}]   ;;  %s820_s1 = inlined_call_operand.vmem [shape: s32[2,1,8,128], index: 1, kind: input, shape index: {}]   ;;  %s821_s2 = inlined_call_operand.vmem [shape: f32[2,1,128], index: 2, kind: output, shape index: {0}]   ;;  %s822_s3 = inlined_call_operand.vmem [shape: f32[2,3,4,128], index: 3, kind: output, shape index: {1}]  }
   0x1   :  { %s689_s14 = smov 0  }
   0x2 LB: > { %s26_s15 = sadd.s32 1, %s658_s13  ;;  %p587_p0 = scmp.ge.s32.totalorder %s662_s14, 1  ;;  %s662_s14 = sphi %s689_s14, %s14_s14   ;;  %s658_s13 = sphi %s687_s13, %s824_s13   ;;  %s654_s12 = sphi %s685_s12, %s823_s12  }
   0x3   : > { %p28_p1 = scmp.ge.s32.totalorder %s26_s15, 2  ;;  %p171_p2 = scmp.lt.s32.totalorder %s662_s14, 3 }
   0x5   : > { %s826_s15 = smov (%p28_p1, %s26_s15), 0  ;;  %p172_p3 = pnand %p587_p0, %p171_p2 }
   0x6   : > { %p208_p4 = scmp.lt.s32.totalorder (!%p172_p3), %s654_s12, 1  ;;  %v664_v8 = vmov (!%p172_p3), 0.0   ;;  %vm390_vm4 = vcmask (!%p172_p3), 1041409   ;;  %vm392_vm5 = vcmask (!%p172_p3), 1042434   ;;  %vm394_vm6 = vcmask (!%p172_p3), 1043459  }
   0x7   : > { %175 = sbr.rel (%p172_p3) target bundleno = 86 (0x56), region = 28 }
   0xe   : > { %s828_s12 = smov (!%p208_p4, %s654_s12), 1 }
   0xf   : > { %s601_s16 = sshll.u32 %s828_s12, 5  ;;  %s590_s17 = sshll.u32 %s828_s12, 3 }
  0x10   : > { %s215_s20 = scalar_lea.vmem %s819_s0, %s601_s16  ;;  %s222_s23 = scalar_lea.vmem %s820_s1, %s590_s17 }
  0x11   : > { %v713_v0 = vld [vmem:[%s215_s20] sm:$0xff]  ;;  %v715_v1 = vld [vmem:[%s215_s20 + $0x8] sm:$0xff]  ;;  %v717_v2 = vld [vmem:[%s215_s20 + $0x10] sm:$0xff]  ;;  %s602_s24 = smul.u32 12, %s828_s12  ;;  %s225_s30 = scalar_lea.vmem %s821_s2, %s828_s12 }
  0x12   : > { %v719_v3 = vld [vmem:[%s215_s20 + $0x18] sm:$0xff]  ;;  %v721_v4 = vld [vmem:[%s222_s23] sm:$0xff]  ;;  %v253_v5 = vmax.f32 %v713_v0, %v715_v1 }
  0x13   : > { %v254_v6 = vmax.f32 %v717_v2, %v719_v3  ;;  %vm283_vm0 = vcmp.eq.s32.totalorder %v721_v4, 0  ;;  %vm284_vm1 = vcmp.eq.s32.totalorder %v721_v4, 1  ;;  %vm285_vm2 = vcmp.eq.s32.totalorder %v721_v4, 2  ;;  %s774_s27 = scalar_lea.vmem %s822_s3, %s602_s24 }
  0x14   : > { %v735_v9 = vsel %vm283_vm0, 1.0, %v664_v8  ;;  %v740_v10 = vsel %vm284_vm1, 1.0, %v664_v8  ;;  %vm286_vm3 = vcmp.eq.s32.totalorder %v721_v4, 3  ;;  %v754_v15 = vsel %vm285_vm2, 1.0, %v664_v8 }
  0x15   : > { %v727_v7 = vmax.f32 %v253_v5, %v254_v6  ;;  %v440_v16 = vrot.slane %v735_v9, 4  ;;  %v446_v17 = vrot.slane %v740_v10, 4  ;;  %v761_v22 = vsel %vm286_vm3, 1.0, %v664_v8 }
  0x16   : > { %v452_v25 = vrot.slane %v754_v15, 4  ;;  %v458_v26 = vrot.slane %v761_v22, 4  ;;  %v295_v55 = vsel %vm283_vm0, %v713_v0, 0.0  ;;  %v296_v56 = vsel %vm284_vm1, %v715_v1, 0.0 }
  0x17   : > { %v256_v11 = vsub.f32 %v713_v0, %v727_v7  ;;  %v257_v12 = vsub.f32 %v715_v1, %v727_v7  ;;  %v258_v13 = vsub.f32 %v717_v2, %v727_v7  ;;  %v259_v14 = vsub.f32 %v719_v3, %v727_v7 }
  0x18   : > { %v441_v23 = vadd.f32 %v735_v9, %v440_v16  ;;  %v447_v24 = vadd.f32 %v740_v10, %v446_v17  ;;  %v453_v29 = vadd.f32 %v754_v15, %v452_v25  ;;  %v459_v30 = vadd.f32 %v761_v22, %v458_v26 }
  0x19   : > { %v260_v18 = vmul.f32 1.442695, %v256_v11  ;;  %v262_v19 = vmul.f32 1.442695, %v257_v12  ;;  %v264_v20 = vmul.f32 1.442695, %v258_v13  ;;  %v299_v57 = vadd.f32 %v296_v56, %v295_v55 }
  0x1a   : > { %v266_v21 = vmul.f32 1.442695, %v259_v14  ;;  %v442_v27 = vrot.slane %v441_v23, 2  ;;  %v448_v28 = vrot.slane %v447_v24, 2  ;;  %v454_v33 = vrot.slane %v453_v29, 2 }
  0x1b   : > { %628 = vpow2.f32 %v260_v18  ;;  %v460_v34 = vrot.slane %v459_v30, 2  ;;  %v297_v58 = vsel %vm285_vm2, %v717_v2, 0.0  ;;  %vm274_vm7 = vcmp.ge.s32.totalorder %v721_v4, 0 }
  0x1c   : > { %630 = vpow2.f32 %v262_v19  ;;  %v443_v31 = vadd.f32 %v442_v27, %v441_v23  ;;  %v449_v32 = vadd.f32 %v448_v28, %v447_v24  ;;  %v455_v37 = vadd.f32 %v454_v33, %v453_v29 }
  0x1d   : > { %632 = vpow2.f32 %v264_v20  ;;  %v461_v38 = vadd.f32 %v460_v34, %v459_v30  ;;  %v300_v59 = vadd.f32 %v299_v57, %v297_v58  ;;  %v298_v60 = vsel %vm286_vm3, %v719_v3, 0.0 }
  0x1e   : > { %634 = vpow2.f32 %v266_v21  ;;  %v444_v35 = vrot.slane %v443_v31, 1  ;;  %v450_v36 = vrot.slane %v449_v32, 1  ;;  %v456_v41 = vrot.slane %v455_v37, 1 }
  0x1f   : > { %v462_v42 = vrot.slane %v461_v38, 1  ;;  %v592_v61 = vsel %vm274_vm7, 1.0, %v664_v8  ;;  %v301_v5 = vadd.f32 %v300_v59, %v298_v60 }
  0x20   : > { %v445_v39 = vadd.f32 %v444_v35, %v443_v31  ;;  %v451_v40 = vadd.f32 %v450_v36, %v449_v32  ;;  %v457_v45 = vadd.f32 %v456_v41, %v455_v37 }
  0x21   : > { %v463_v46 = vadd.f32 %v462_v42, %v461_v38 }
  0x22   : > { %v468_v43 = vsel %vm390_vm4, %v451_v40, %v445_v39 }
  0x23   : > { %v469_v50 = vsel %vm392_vm5, %v457_v45, %v468_v43 }
  0x24   : > { %v470_v52 = vsel %vm394_vm6, %v463_v46, %v469_v50 }
  0x25   : > { %v629_v44 = vpop.eup %628  ;;  %598 = vst [vmem:[%s774_s27 + $0x8] sm:$0xf] %v470_v52 }
  0x26   : > { %v631_v47 = vpop.eup %630 }
  0x27   : > { %v633_v48 = vpop.eup %632  ;;  %v268_v49 = vadd.f32 %v631_v47, %v629_v44 }
  0x28   : > { %v635_v51 = vpop.eup %634 }
  0x29   : > { %v269_v53 = vadd.f32 %v633_v48, %v268_v49 }
  0x2b   : > { %v270_v54 = vadd.f32 %v635_v51, %v269_v53 }
  0x2d   : > { %636 = vlog2.f32 %v270_v54 }
  0x2e   : > { %638 = vrcp.f32 %v270_v54 }
  0x37   : > { %v637_v62 = vpop.eup %636 }
  0x38   : > { %v639_v63 = vpop.eup %638  ;;  %v272_v0 = vmul.f32 0.6931472, %v637_v62 }
  0x39   : > { %v278_v1 = vmul.f32 %v639_v63, %v592_v61 }
  0x3a   : > { %v273_v6 = vadd.f32 %v272_v0, %v727_v7 }
  0x3b   : > { %v279_v11 = vmul.f32 %v629_v44, %v278_v1  ;;  %v280_v12 = vmul.f32 %v631_v47, %v278_v1  ;;  %v281_v13 = vmul.f32 %v633_v48, %v278_v1  ;;  %v282_v2 = vmul.f32 %v635_v51, %v278_v1 }
  0x3c   : > { %v303_v14 = vsub.f32 %v273_v6, %v301_v5 }
  0x3d   : > { %v311_v16 = vmul.f32 %v735_v9, %v279_v11  ;;  %v312_v17 = vmul.f32 %v740_v10, %v280_v12  ;;  %v313_v3 = vmul.f32 %v754_v15, %v281_v13  ;;  %v314_v4 = vmul.f32 %v761_v22, %v282_v2 }
  0x3e   : > { %v304_v8 = vmul.f32 %v592_v61, %v303_v14  ;;  %v402_v18 = vrot.slane %v279_v11, 4  ;;  %v408_v19 = vrot.slane %v280_v12, 4  ;;  %v414_v20 = vrot.slane %v281_v13, 4 }
  0x3f   : > { %v362_v21 = vrot.slane %v311_v16, 4  ;;  %v368_v23 = vrot.slane %v312_v17, 4  ;;  %v374_v7 = vrot.slane %v313_v3, 4  ;;  %v380_v24 = vrot.slane %v314_v4, 4 }
  0x40   : > { %v351_v25 = vrot.slane %v304_v8, 4  ;;  %v403_v26 = vadd.f32 %v402_v18, %v279_v11  ;;  %v409_v27 = vadd.f32 %v408_v19, %v280_v12  ;;  %v415_v28 = vadd.f32 %v414_v20, %v281_v13 }
  0x41   : > { %v363_v29 = vadd.f32 %v362_v21, %v311_v16  ;;  %v369_v9 = vadd.f32 %v368_v23, %v312_v17  ;;  %v375_v30 = vadd.f32 %v374_v7, %v313_v3  ;;  %v381_v10 = vadd.f32 %v380_v24, %v314_v4 }
  0x42   : > { %v352_v31 = vadd.f32 %v351_v25, %v304_v8  ;;  %v404_v15 = vrot.slane %v403_v26, 2  ;;  %v410_v32 = vrot.slane %v409_v27, 2  ;;  %v416_v22 = vrot.slane %v415_v28, 2 }
  0x43   : > { %v364_v33 = vrot.slane %v363_v29, 2  ;;  %v370_v34 = vrot.slane %v369_v9, 2  ;;  %v376_v35 = vrot.slane %v375_v30, 2  ;;  %v382_v36 = vrot.slane %v381_v10, 2 }
  0x44   : > { %v353_v37 = vrot.slane %v352_v31, 2  ;;  %v405_v38 = vadd.f32 %v404_v15, %v403_v26  ;;  %v411_v39 = vadd.f32 %v410_v32, %v409_v27  ;;  %v417_v45 = vadd.f32 %v416_v22, %v415_v28 }
  0x45   : > { %v365_v40 = vadd.f32 %v364_v33, %v363_v29  ;;  %v371_v41 = vadd.f32 %v370_v34, %v369_v9  ;;  %v377_v42 = vadd.f32 %v376_v35, %v375_v30  ;;  %v383_v43 = vadd.f32 %v382_v36, %v381_v10 }
  0x46   : > { %v354_v44 = vadd.f32 %v353_v37, %v352_v31  ;;  %v406_v51 = vrot.slane %v405_v38, 1  ;;  %v412_v52 = vrot.slane %v411_v39, 1  ;;  %v420_v58 = vrot.slane %v282_v2, 4 }
  0x47   : > { %v366_v46 = vrot.slane %v365_v40, 1  ;;  %v372_v47 = vrot.slane %v371_v41, 1  ;;  %v378_v48 = vrot.slane %v377_v42, 1  ;;  %v384_v49 = vrot.slane %v383_v43, 1 }
  0x48   : > { %v355_v50 = vrot.slane %v354_v44, 1  ;;  %v418_v60 = vrot.slane %v417_v45, 1  ;;  %v407_v62 = vadd.f32 %v406_v51, %v405_v38  ;;  %v413_v63 = vadd.f32 %v412_v52, %v411_v39 }
  0x49   : > { %v367_v53 = vadd.f32 %v366_v46, %v365_v40  ;;  %v373_v54 = vadd.f32 %v372_v47, %v371_v41  ;;  %v379_v55 = vadd.f32 %v378_v48, %v377_v42  ;;  %v385_v56 = vadd.f32 %v384_v49, %v383_v43 }
  0x4a   : > { %v356_v57 = vadd.f32 %v355_v50, %v354_v44  ;;  %v421_v0 = vadd.f32 %v420_v58, %v282_v2  ;;  %v419_v6 = vadd.f32 %v418_v60, %v417_v45  ;;  %v430_v12 = vsel %vm390_vm4, %v413_v63, %v407_v62 }
  0x4b   : > { %v391_v59 = vsel %vm390_vm4, %v373_v54, %v367_v53 }
  0x4c   : > { %357 = vst [vmem:[%s225_s30] sm:$0x1] %v356_v57  ;;  %v393_v61 = vsel %vm392_vm5, %v379_v55, %v391_v59  ;;  %v422_v1 = vrot.slane %v421_v0, 2  ;;  %v431_v14 = vsel %vm392_vm5, %v419_v6, %v430_v12 }
  0x4d   : > { %v395_v5 = vsel %vm394_vm6, %v385_v56, %v393_v61 }
  0x4e   : > { %397 = vst [vmem:[%s774_s27] sm:$0xf] %v395_v5  ;;  %v423_v11 = vadd.f32 %v422_v1, %v421_v0 }
  0x50   : > { %v424_v13 = vrot.slane %v423_v11, 1 }
  0x52   : > { %v425_v16 = vadd.f32 %v424_v13, %v423_v11 }
  0x54   : > { %v432_v17 = vsel %vm394_vm6, %v425_v16, %v431_v14 }
  0x55   : > { %597 = vst [vmem:[%s774_s27 + $0x4] sm:$0xf] %v432_v17 }
  0x56 PF: > { %s14_s14 = sadd.s32 1, %s662_s14   ;;  %s823_s12 = smov %s658_s13 }
  0x57   : > { %p11_p5 = scmp.ge.s32.totalorder %s14_s14, 4   ;;  %s824_s13 = smov %s826_s15 }
  0x59   :  { %13 = sbr.rel (!%p11_p5) target bundleno = 2 (0x2), region = 83 }

</bundles_post_ra>
